<compile_context>
chip_gen: v6e
topology: v6e:2x2x1
jax: 0.10.0
libtpu: 0.0.40
codegen_flags: <defaults>
</compile_context>

<pallas_src>
import functools

import jax
import jax.numpy as jnp
from jax.experimental import pallas as pl
from jax.experimental.pallas import tpu as pltpu


def _round_up(x, m):
    return ((x + m - 1) // m) * m


# ----------------------------- Pallas kernel --------------------------------
def _mlp_kernel(x_ref, gw_ref, uw_ref, dw_ref, o_ref, acc_ref):
    # x_ref:   (tm, H)   bf16 tile of tokens
    # gw_ref:  (H, ti)   gate_proj weight tile for intermediate block j
    # uw_ref:  (H, ti)   up_proj   weight tile for intermediate block j
    # dw_ref:  (ti, H)   down_proj weight tile for intermediate block j
    # o_ref:   (tm, H)   output tile (written on last j)
    # acc_ref: (tm, H)   f32 accumulator over the intermediate dimension
    j = pl.program_id(1)

    @pl.when(j == 0)
    def _():
        acc_ref[...] = jnp.zeros_like(acc_ref)

    x = x_ref[...]
    gate = jnp.dot(x, gw_ref[...], preferred_element_type=jnp.float32)
    up = jnp.dot(x, uw_ref[...], preferred_element_type=jnp.float32)
    # SiLU(gate) * up  (Llama hidden_act == "silu"), computed in f32 on the VPU;
    # sigmoid's exp/recip run on the EUP (separate bundle slot).
    hidden = (gate * jax.nn.sigmoid(gate)) * up
    acc_ref[...] += jnp.dot(
        hidden.astype(dw_ref.dtype), dw_ref[...], preferred_element_type=jnp.float32
    )

    @pl.when(j == pl.num_programs(1) - 1)
    def _():
        o_ref[...] = acc_ref[...].astype(o_ref.dtype)


# ------------------------------ Pallas wrapper -------------------------------
def custom_llama_mlp_pallas(x, gate_w, up_w, down_w, *, tm=256, ti=512,
                            compute_dtype=jnp.bfloat16):
    """x: (B, S, H); weights in PyTorch CustomLinear convention W[in, out]."""
    B, S, H = x.shape
    I = gate_w.shape[1]
    M = B * S

    bc = jnp.dtype(compute_dtype).itemsize
    ob = jnp.dtype(x.dtype).itemsize

    # Clamp tile sizes to the (aligned) problem size; keep sublane/lane alignment.
    tm = min(tm, _round_up(M, 16))        # multiple of 16 (bf16 sublane packing)
    ti = min(ti, _round_up(I, 128))       # multiple of 128 (lane width)

    # Shrink the intermediate tile until the double-buffered working set
    # (x, gate/up/down weight tiles, output tiles, f32 accumulator) fits
    # comfortably within a v7x TensorCore's 64 MiB VMEM.
    def vmem_est(tm_, ti_):
        return (2 * tm_ * H * bc            # x tiles
                + 4 * H * ti_ * bc          # gate + up weight tiles
                + 2 * ti_ * H * bc          # down weight tiles
                + 2 * tm_ * H * ob          # output tiles
                + tm_ * H * 4)              # f32 accumulator scratch

    VMEM_BUDGET = 48 * 1024 * 1024
    while ti > 128 and vmem_est(tm, ti) > VMEM_BUDGET:
        ti = max(128, ((ti // 2) // 128) * 128)

    Mp = _round_up(M, tm)
    Ip = _round_up(I, ti)
    n_i = Ip // ti

    x2d = x.reshape(M, H).astype(compute_dtype)
    if Mp != M:
        x2d = jnp.pad(x2d, ((0, Mp - M), (0, 0)))   # padded tokens produce zeros

    gw = gate_w.astype(compute_dtype)
    uw = up_w.astype(compute_dtype)
    dw = down_w.astype(compute_dtype)
    if Ip != I:
        # Padded intermediate columns/rows are zero -> contribute nothing.
        gw = jnp.pad(gw, ((0, 0), (0, Ip - I)))
        uw = jnp.pad(uw, ((0, 0), (0, Ip - I)))
        dw = jnp.pad(dw, ((0, Ip - I), (0, 0)))

    vmem_limit = int(min(max(2 * vmem_est(tm, ti), 16 * 1024 * 1024),
                         64 * 1024 * 1024))

    out2d = pl.pallas_call(
        _mlp_kernel,
        out_shape=jax.ShapeDtypeStruct((Mp, H), x.dtype),
        grid_spec=pltpu.PrefetchScalarGridSpec(
            num_scalar_prefetch=0,
            grid=(Mp // tm, n_i),
            in_specs=[
                pl.BlockSpec((tm, H), lambda i, j: (i, 0)),   # token tile
                pl.BlockSpec((H, ti), lambda i, j: (0, j)),   # gate weight tile
                pl.BlockSpec((H, ti), lambda i, j: (0, j)),   # up weight tile
                pl.BlockSpec((ti, H), lambda i, j: (j, 0)),   # down weight tile
            ],
            out_specs=pl.BlockSpec((tm, H), lambda i, j: (i, 0)),
            scratch_shapes=[pltpu.VMEM((tm, H), jnp.float32)],
        ),
        compiler_params=pltpu.CompilerParams(
            dimension_semantics=("parallel", "arbitrary"),
            vmem_limit_bytes=vmem_limit,
        ),
    )(x2d, gw, uw, dw)

    return out2d[:M].reshape(B, S, H)


# --------------------- CustomLinear weight materialization ------------------
def make_custom_linear_weight(vector_bank, index, input_dim, output_dim):
    # Exactly mirrors: vector = vector_bank[index]; weight = vector.view(in, out)
    vector = vector_bank[index]                      # (index_len, vector_dim)
    return vector.reshape(input_dim, output_dim)     # row-major, same as torch .view


@functools.partial(
    jax.jit, static_argnames=("hidden_size", "intermediate_size", "tm", "ti")
)
def custom_llama_mlp(x, vector_bank, gate_index, up_index, down_index,
                     *, hidden_size, intermediate_size, tm=256, ti=512):
    """Full CustomLlamaMLP forward: bank gather + fused Pallas MLP, one jit."""
    # Cast the (small) bank before the gather so the large materialized weights
    # are written to HBM once, already in bf16.
    bank_c = vector_bank.astype(jnp.bfloat16)
    gate_w = make_custom_linear_weight(bank_c, gate_index, hidden_size, intermediate_size)
    up_w = make_custom_linear_weight(bank_c, up_index, hidden_size, intermediate_size)
    down_w = make_custom_linear_weight(bank_c, down_index, intermediate_size, hidden_size)
    # TODO(synk): mlp_bias=True path (per-projection bias add) not implemented.
    return custom_llama_mlp_pallas(x, gate_w, up_w, down_w, tm=tm, ti=ti)


# --------------------------------- main --------------------------------------
if __name__ == "__main__":
    # Small config consistent with the module (hidden_act="silu", mlp_bias=False).
    hidden_size = 256
    intermediate_size = 512
    vector_dim = 32          # config.vector_bank_dim
    batch, seq = 3, 33       # M = 99 tokens -> exercises the ragged-tail padding

    idx_len_gu = hidden_size * intermediate_size // vector_dim
    idx_len_d = intermediate_size * hidden_size // vector_dim
    bank_rows = max(idx_len_gu, idx_len_d)

    key = jax.random.PRNGKey(0)
    k_bank, k_gi, k_ui, k_di, k_x = jax.random.split(key, 5)

    vector_bank = jax.random.normal(k_bank, (bank_rows, vector_dim), dtype=jnp.float32) * 0.02
    gate_index = jax.random.randint(k_gi, (idx_len_gu,), 0, idx_len_gu, dtype=jnp.int32)
    up_index = jax.random.randint(k_ui, (idx_len_gu,), 0, idx_len_gu, dtype=jnp.int32)
    down_index = jax.random.randint(k_di, (idx_len_d,), 0, idx_len_d, dtype=jnp.int32)

    x = jax.random.normal(k_x, (batch, seq, hidden_size), dtype=jnp.float32)

    # Small tiles here so the toy shape exercises both grid axes (M tiles + I
    # accumulation); production shapes should use the defaults (tm=256, ti=512).
    out = custom_llama_mlp(
        x, vector_bank, gate_index, up_index, down_index,
        hidden_size=hidden_size, intermediate_size=intermediate_size,
        tm=64, ti=256,
    )
    out = jax.block_until_ready(out)

    # Pure-JAX f32 reference (kernel computes in bf16 -> loose tolerance).
    gate_w = make_custom_linear_weight(vector_bank, gate_index, hidden_size, intermediate_size)
    up_w = make_custom_linear_weight(vector_bank, up_index, hidden_size, intermediate_size)
    down_w = make_custom_linear_weight(vector_bank, down_index, intermediate_size, hidden_size)

    def ref(x, gw, uw, dw):
        g = x @ gw
        u = x @ uw
        return (jax.nn.silu(g) * u) @ dw

    expected = ref(x, gate_w, up_w, down_w)
    assert out.shape == (batch, seq, hidden_size)
    rel_err = jnp.max(jnp.abs(out - expected)) / (jnp.max(jnp.abs(expected)) + 1e-6)
    assert float(rel_err) < 5e-2, f"relative error too large: {float(rel_err)}"

    print("KERNEL_OK")
</pallas_src>

<mosaic_0001>
module attributes {stable_mosaic.version = 11 : i64} {
  func.func @_mlp_kernel(%arg0: i32, %arg1: i32, %arg2: memref<64x256xbf16, #tpu.memory_space<vmem>>, %arg3: memref<256x256xbf16, #tpu.memory_space<vmem>>, %arg4: memref<256x256xbf16, #tpu.memory_space<vmem>>, %arg5: memref<256x256xbf16, #tpu.memory_space<vmem>>, %arg6: memref<64x256xf32, #tpu.memory_space<vmem>>, %arg7: memref<64x256xf32, #tpu.memory_space<vmem>>) attributes {dimension_semantics = [#tpu.dimension_semantics<parallel>, #tpu.dimension_semantics<arbitrary>], iteration_bounds = array<i64: 2, 2>, scalar_prefetch = 0 : i64, scratch_operands = 1 : i64, tpu.core_type = #tpu.core_type<tc>, window_params = [{transform_indices = @transform_0, window_bounds = array<i64: 64, 256>}, {transform_indices = @transform_1, window_bounds = array<i64: 256, 256>}, {transform_indices = @transform_2, window_bounds = array<i64: 256, 256>}, {transform_indices = @transform_3, window_bounds = array<i64: 256, 256>}, {transform_indices = @transform_4, window_bounds = array<i64: 64, 256>}]} {
    %c0_i32 = arith.constant 0 : i32
    %0 = arith.cmpi eq, %arg1, %c0_i32 : i32
    %1 = arith.extui %0 : i1 to i32
    %c0_i32_0 = arith.constant 0 : i32
    %2 = arith.cmpi ne, %1, %c0_i32_0 : i32
    scf.if %2 {
      %cst_16 = arith.constant 0.000000e+00 : f32
      %24 = vector.broadcast %cst_16 : f32 to vector<64x256xf32>
      %c0_17 = arith.constant 0 : index
      %c0_18 = arith.constant 0 : index
      %25 = vector.load %arg7[%c0_17, %c0_18] : memref<64x256xf32, #tpu.memory_space<vmem>>, vector<64x256xf32>
      tpu.vector_store %arg7[%c0_17, %c0_18], %24 {strides = array<i32>} : memref<64x256xf32, #tpu.memory_space<vmem>>, vector<64x256xf32>,
    } else {
    }
    %c0 = arith.constant 0 : index
    %c0_1 = arith.constant 0 : index
    %3 = vector.load %arg2[%c0, %c0_1] : memref<64x256xbf16, #tpu.memory_space<vmem>>, vector<64x256xbf16>
    %c0_2 = arith.constant 0 : index
    %c0_3 = arith.constant 0 : index
    %4 = vector.load %arg3[%c0_2, %c0_3] : memref<256x256xbf16, #tpu.memory_space<vmem>>, vector<256x256xbf16>
    %cst = arith.constant dense<0.000000e+00> : vector<64x256xf32>
    %5 = tpu.matmul %3, %4, %cst {dimension_numbers = #tpu.dot_dimension_numbers<[1], [0], [0], [1], [0, 0, 1, 1], [], []>} : vector<64x256xbf16>, vector<256x256xbf16>, vector<64x256xf32> -> vector<64x256xf32>
    %c0_4 = arith.constant 0 : index
    %c0_5 = arith.constant 0 : index
    %6 = vector.load %arg4[%c0_4, %c0_5] : memref<256x256xbf16, #tpu.memory_space<vmem>>, vector<256x256xbf16>
    %cst_6 = arith.constant dense<0.000000e+00> : vector<64x256xf32>
    %7 = tpu.matmul %3, %6, %cst_6 {dimension_numbers = #tpu.dot_dimension_numbers<[1], [0], [0], [1], [0, 0, 1, 1], [], []>} : vector<64x256xbf16>, vector<256x256xbf16>, vector<64x256xf32> -> vector<64x256xf32>
    %8 = arith.negf %5 : vector<64x256xf32>
    %9 = math.exp %8 : vector<64x256xf32>
    %cst_7 = arith.constant 1.000000e+00 : f32
    %10 = vector.broadcast %cst_7 : f32 to vector<64x256xf32>
    %11 = arith.addf %10, %9 : vector<64x256xf32>
    %12 = arith.divf %10, %11 : vector<64x256xf32>
    %13 = arith.mulf %5, %12 : vector<64x256xf32>
    %14 = arith.mulf %13, %7 : vector<64x256xf32>
    %c0_8 = arith.constant 0 : index
    %c0_9 = arith.constant 0 : index
    %15 = vector.load %arg7[%c0_8, %c0_9] : memref<64x256xf32, #tpu.memory_space<vmem>>, vector<64x256xf32>
    %16 = arith.truncf %14 : vector<64x256xf32> to vector<64x256xbf16>
    %c0_10 = arith.constant 0 : index
    %c0_11 = arith.constant 0 : index
    %17 = vector.load %arg5[%c0_10, %c0_11] : memref<256x256xbf16, #tpu.memory_space<vmem>>, vector<256x256xbf16>
    %cst_12 = arith.constant dense<0.000000e+00> : vector<64x256xf32>
    %18 = tpu.matmul %16, %17, %cst_12 {dimension_numbers = #tpu.dot_dimension_numbers<[1], [0], [0], [1], [0, 0, 1, 1], [], []>} : vector<64x256xbf16>, vector<256x256xbf16>, vector<64x256xf32> -> vector<64x256xf32>
    %19 = arith.addf %15, %18 : vector<64x256xf32>
    %c0_13 = arith.constant 0 : index
    %c0_14 = arith.constant 0 : index
    %20 = vector.load %arg7[%c0_13, %c0_14] : memref<64x256xf32, #tpu.memory_space<vmem>>, vector<64x256xf32>
    tpu.vector_store %arg7[%c0_13, %c0_14], %19 {strides = array<i32>} : memref<64x256xf32, #tpu.memory_space<vmem>>, vector<64x256xf32>,
    %c1_i32 = arith.constant 1 : i32
    %21 = arith.cmpi eq, %arg1, %c1_i32 : i32
    %22 = arith.extui %21 : i1 to i32
    %c0_i32_15 = arith.constant 0 : i32
    %23 = arith.cmpi ne, %22, %c0_i32_15 : i32
    scf.if %23 {
      %c0_16 = arith.constant 0 : index
      %c0_17 = arith.constant 0 : index
      %24 = vector.load %arg7[%c0_16, %c0_17] : memref<64x256xf32, #tpu.memory_space<vmem>>, vector<64x256xf32>
      %c0_18 = arith.constant 0 : index
      %c0_19 = arith.constant 0 : index
      %25 = vector.load %arg6[%c0_18, %c0_19] : memref<64x256xf32, #tpu.memory_space<vmem>>, vector<64x256xf32>
      tpu.vector_store %arg6[%c0_18, %c0_19], %24 {strides = array<i32>} : memref<64x256xf32, #tpu.memory_space<vmem>>, vector<64x256xf32>,
    } else {
    }
    return
  }
  func.func @transform_0(%arg0: i32, %arg1: i32) -> (i32, i32) {
    %c0_i32 = arith.constant 0 : i32
    %c0_i32_0 = arith.constant 0 : i32
    return %arg0, %c0_i32 : i32, i32
  }
  func.func @transform_1(%arg0: i32, %arg1: i32) -> (i32, i32) {
    %c0_i32 = arith.constant 0 : i32
    %c0_i32_0 = arith.constant 0 : i32
    return %c0_i32, %arg1 : i32, i32
  }
  func.func @transform_2(%arg0: i32, %arg1: i32) -> (i32, i32) {
    %c0_i32 = arith.constant 0 : i32
    %c0_i32_0 = arith.constant 0 : i32
    return %c0_i32, %arg1 : i32, i32
  }
  func.func @transform_3(%arg0: i32, %arg1: i32) -> (i32, i32) {
    %c0_i32 = arith.constant 0 : i32
    %c0_i32_0 = arith.constant 0 : i32
    return %arg1, %c0_i32 : i32, i32
  }
  func.func @transform_4(%arg0: i32, %arg1: i32) -> (i32, i32) {
    %c0_i32 = arith.constant 0 : i32
    %c0_i32_0 = arith.constant 0 : i32
    return %arg0, %c0_i32 : i32, i32
  }
}

</mosaic_0001>

<bundles_post_ra>
// kernel: custom_llama_mlp.1
= control target key start
LH: loop header
LB: loop body
LE: loop exit
PB: predicated region body
PF: predicated region fallthrough
CT: control target
= control target key end

     0   :  { %s2348_s15 = smov 0   ;;  %s2350_s16 = smov 0   ;;  %s2806_s0 = inlined_call_operand.vmem [shape: bf16[128,256], index: 0, kind: input, shape index: {}]   ;;  %s2807_s1 = inlined_call_operand.vmem [shape: bf16[256,512], index: 1, kind: input, shape index: {}]   ;;  %s2808_s2 = inlined_call_operand.vmem [shape: bf16[256,512], index: 2, kind: input, shape index: {}]   ;;  %s2809_s3 = inlined_call_operand.vmem [shape: bf16[512,256], index: 3, kind: input, shape index: {}]   ;;  %s2810_s4 = inlined_call_operand.vmem [shape: f32[128,256], index: 4, kind: output, shape index: {}]  }
   0x1   :  { %s2352_s17 = smov 0   ;;  %s2354_s18 = smov 0  }
   0x2   :  { %s2356_s19 = smov 0   ;;  %s2358_s20 = smov 0  }
   0x3   :  { %s2360_s21 = smov 0  }
   0x4 LB: > { %s23_s22 = sadd.s32 1, %s2312_s19  ;;  %s26_s23 = sadd.s32 1, %s2316_s20  ;;  %s2320_s21 = sphi %s2360_s21, %s14_s21   ;;  %s2316_s20 = sphi %s2358_s20, %s2817_s20   ;;  %s2312_s19 = sphi %s2356_s19, %s2816_s19   ;;  %s2308_s18 = sphi %s2354_s18, %s2815_s18   ;;  %s2304_s17 = sphi %s2352_s17, %s2814_s17   ;;  %s2300_s16 = sphi %s2350_s16, %s2813_s16   ;;  %s2296_s15 = sphi %s2348_s15, %s2812_s15  }
   0x5   : > { %p24_p0 = scmp.ge.s32.totalorder %s23_s22, 2  ;;  %s59_s24 = sadd.s32 1, %s2300_s16 }
   0x6   : > { %p66_p1 = scmp.ne.s32.totalorder %s2300_s16, %s2296_s15  ;;  %p67_p2 = scmp.eq.s32.totalorder %s2320_s21, 0 }
   0x7   : > { %s2819_s22 = smov (%p24_p0, %s23_s22), 0  ;;  %s2821_s23 = smov (!%p24_p0, %s26_s23), %s2316_s20 }
   0x8   : > { %s56_s25 = ssub.s32 %s2312_s19, %s2819_s22  ;;  %p2394_p3 = por %p67_p2, %p66_p1 }
   0x9   : > { %p28_p4 = scmp.ge.s32.totalorder %s2821_s23, 2  ;;  %p57_p5 = scmp.eq.s32.totalorder %s56_s25, 0 }
   0xa   : > { %p1809_p6 = scmp.ge.s32.totalorder %s2320_s21, 4 }
   0xb   : > { %s2823_s23 = smov (%p28_p4, %s2821_s23), 0 }
   0xc   : > { %s2401_s27 = scalar_select %p57_p5, %s2300_s16, %s59_s24  }
   0xd   : > { %170 = sbr.rel (%p1809_p6) target bundleno = 58 (0x3a), region = 16 }
  0x12   : > { %183 = sbr.rel (!%p2394_p3) target bundleno = 38 (0x26), region = 24  ;;  %s185_s28 = sand.u32 (%p2394_p3), 1, %s2300_s16  }
  0x13   : > { %s1952_s29 = sshll.u32 (%p2394_p3), %s2312_s19, 3  ;;  %s1810_s30 = sshll.u32 (%p2394_p3), %s185_s28, 8 }
  0x14   : > { %s2411_s7 = scalar_lea.vmem (%p2394_p3), %s2807_s1, %s1952_s29  ;;  %s2416_s8 = scalar_lea.vmem (%p2394_p3), [#allocation3], %s1810_s30 }
  0x15   : > { %v281_v0 = vld [vmem:[%s2411_s7] sm:$0xff] (%p2394_p3)  ;;  %v283_v1 = vld [vmem:[%s2411_s7 + $0x10] sm:$0xff] (%p2394_p3) }
  0x16   : > { %v285_v2 = vld [vmem:[%s2411_s7 + $0x20] sm:$0xff] (%p2394_p3)  ;;  %282 = vst [vmem:[%s2416_s8] sm:$0xff] (%p2394_p3), %v281_v0  ;;  %284 = vst [vmem:[%s2416_s8 + $0x8] sm:$0xff] (%p2394_p3), %v283_v1  ;;  %v287_v3 = vld [vmem:[%s2411_s7 + $0x30] sm:$0xff] (%p2394_p3) }
  0x17   : > { %286 = vst [vmem:[%s2416_s8 + $0x10] sm:$0xff] %v285_v2  ;;  %v289_v4 = vld [vmem:[%s2411_s7 + $0x40] sm:$0xff]  ;;  %v291_v5 = vld [vmem:[%s2411_s7 + $0x50] sm:$0xff]  ;;  %288 = vst [vmem:[%s2416_s8 + $0x18] sm:$0xff] %v287_v3 }
  0x18   : > { %290 = vst [vmem:[%s2416_s8 + $0x20] sm:$0xff] %v289_v4  ;;  %292 = vst [vmem:[%s2416_s8 + $0x28] sm:$0xff] %v291_v5  ;;  %v293_v6 = vld [vmem:[%s2411_s7 + $0x60] sm:$0xff]  ;;  %v295_v7 = vld [vmem:[%s2411_s7 + $0x70] sm:$0xff] }
  0x19   : > { %v297_v8 = vld [vmem:[%s2411_s7 + $0x80] sm:$0xff]  ;;  %294 = vst [vmem:[%s2416_s8 + $0x30] sm:$0xff] %v293_v6  ;;  %296 = vst [vmem:[%s2416_s8 + $0x38] sm:$0xff] %v295_v7  ;;  %v299_v9 = vld [vmem:[%s2411_s7 + $0x90] sm:$0xff] }
  0x1a   : > { %298 = vst [vmem:[%s2416_s8 + $0x40] sm:$0xff] %v297_v8  ;;  %v301_v10 = vld [vmem:[%s2411_s7 + $0xa0] sm:$0xff]  ;;  %v303_v11 = vld [vmem:[%s2411_s7 + $0xb0] sm:$0xff]  ;;  %300 = vst [vmem:[%s2416_s8 + $0x48] sm:$0xff] %v299_v9 }
  0x1b   : > { %302 = vst [vmem:[%s2416_s8 + $0x50] sm:$0xff] %v301_v10  ;;  %304 = vst [vmem:[%s2416_s8 + $0x58] sm:$0xff] %v303_v11  ;;  %v305_v12 = vld [vmem:[%s2411_s7 + $0xc0] sm:$0xff]  ;;  %v307_v13 = vld [vmem:[%s2411_s7 + $0xd0] sm:$0xff] }
  0x1c   : > { %v309_v14 = vld [vmem:[%s2411_s7 + $0xe0] sm:$0xff]  ;;  %306 = vst [vmem:[%s2416_s8 + $0x60] sm:$0xff] %v305_v12  ;;  %308 = vst [vmem:[%s2416_s8 + $0x68] sm:$0xff] %v307_v13  ;;  %v311_v15 = vld [vmem:[%s2411_s7 + $0xf0] sm:$0xff] }
  0x1d   : > { %310 = vst [vmem:[%s2416_s8 + $0x70] sm:$0xff] %v309_v14  ;;  %v313_v16 = vld [vmem:[%s2411_s7 + $0x100] sm:$0xff]  ;;  %v315_v17 = vld [vmem:[%s2411_s7 + $0x110] sm:$0xff]  ;;  %312 = vst [vmem:[%s2416_s8 + $0x78] sm:$0xff] %v311_v15 }
  0x1e   : > { %314 = vst [vmem:[%s2416_s8 + $0x80] sm:$0xff] %v313_v16  ;;  %316 = vst [vmem:[%s2416_s8 + $0x88] sm:$0xff] %v315_v17  ;;  %v317_v18 = vld [vmem:[%s2411_s7 + $0x120] sm:$0xff]  ;;  %v319_v19 = vld [vmem:[%s2411_s7 + $0x130] sm:$0xff] }
  0x1f   : > { %v321_v20 = vld [vmem:[%s2411_s7 + $0x140] sm:$0xff]  ;;  %318 = vst [vmem:[%s2416_s8 + $0x90] sm:$0xff] %v317_v18  ;;  %320 = vst [vmem:[%s2416_s8 + $0x98] sm:$0xff] %v319_v19  ;;  %v323_v21 = vld [vmem:[%s2411_s7 + $0x150] sm:$0xff] }
  0x20   : > { %322 = vst [vmem:[%s2416_s8 + $0xa0] sm:$0xff] %v321_v20  ;;  %v325_v22 = vld [vmem:[%s2411_s7 + $0x160] sm:$0xff]  ;;  %v327_v23 = vld [vmem:[%s2411_s7 + $0x170] sm:$0xff]  ;;  %324 = vst [vmem:[%s2416_s8 + $0xa8] sm:$0xff] %v323_v21 }
  0x21   : > { %326 = vst [vmem:[%s2416_s8 + $0xb0] sm:$0xff] %v325_v22  ;;  %328 = vst [vmem:[%s2416_s8 + $0xb8] sm:$0xff] %v327_v23  ;;  %v329_v24 = vld [vmem:[%s2411_s7 + $0x180] sm:$0xff]  ;;  %v331_v25 = vld [vmem:[%s2411_s7 + $0x190] sm:$0xff] }
  0x22   : > { %v333_v26 = vld [vmem:[%s2411_s7 + $0x1a0] sm:$0xff]  ;;  %330 = vst [vmem:[%s2416_s8 + $0xc0] sm:$0xff] %v329_v24  ;;  %332 = vst [vmem:[%s2416_s8 + $0xc8] sm:$0xff] %v331_v25  ;;  %v335_v27 = vld [vmem:[%s2411_s7 + $0x1b0] sm:$0xff] }
  0x23   : > { %334 = vst [vmem:[%s2416_s8 + $0xd0] sm:$0xff] %v333_v26  ;;  %v337_v28 = vld [vmem:[%s2411_s7 + $0x1c0] sm:$0xff]  ;;  %v339_v29 = vld [vmem:[%s2411_s7 + $0x1d0] sm:$0xff]  ;;  %336 = vst [vmem:[%s2416_s8 + $0xd8] sm:$0xff] %v335_v27 }
  0x24   : > { %338 = vst [vmem:[%s2416_s8 + $0xe0] sm:$0xff] %v337_v28  ;;  %340 = vst [vmem:[%s2416_s8 + $0xe8] sm:$0xff] %v339_v29  ;;  %v341_v30 = vld [vmem:[%s2411_s7 + $0x1e0] sm:$0xff]  ;;  %v343_v31 = vld [vmem:[%s2411_s7 + $0x1f0] sm:$0xff] }
  0x25   : > { %342 = vst [vmem:[%s2416_s8 + $0xf0] sm:$0xff] %v341_v30  ;;  %344 = vst [vmem:[%s2416_s8 + $0xf8] sm:$0xff] %v343_v31 }
  0x26 PF: > { %350 = sbr.rel (!%p2394_p3) target bundleno = 58 (0x3a), region = 62  ;;  %s352_s9 = sand.u32 (%p2394_p3), 1, %s2300_s16  }
  0x27   : > { %s1953_s10 = sshll.u32 (%p2394_p3), %s2312_s19, 3  ;;  %s1813_s11 = sshll.u32 (%p2394_p3), %s352_s9, 8 }
  0x28   : > { %s2486_s14 = scalar_lea.vmem (%p2394_p3), %s2808_s2, %s1953_s10  ;;  %s2491_s24 = scalar_lea.vmem (%p2394_p3), [#allocation4], %s1813_s11 }
  0x29   : > { %v448_v32 = vld [vmem:[%s2486_s14] sm:$0xff] (%p2394_p3)  ;;  %v450_v33 = vld [vmem:[%s2486_s14 + $0x10] sm:$0xff] (%p2394_p3) }
  0x2a   : > { %v452_v34 = vld [vmem:[%s2486_s14 + $0x20] sm:$0xff] (%p2394_p3)  ;;  %449 = vst [vmem:[%s2491_s24] sm:$0xff] (%p2394_p3), %v448_v32  ;;  %451 = vst [vmem:[%s2491_s24 + $0x8] sm:$0xff] (%p2394_p3), %v450_v33  ;;  %v454_v35 = vld [vmem:[%s2486_s14 + $0x30] sm:$0xff] (%p2394_p3) }
  0x2b   : > { %453 = vst [vmem:[%s2491_s24 + $0x10] sm:$0xff] %v452_v34  ;;  %v456_v36 = vld [vmem:[%s2486_s14 + $0x40] sm:$0xff]  ;;  %v458_v37 = vld [vmem:[%s2486_s14 + $0x50] sm:$0xff]  ;;  %455 = vst [vmem:[%s2491_s24 + $0x18] sm:$0xff] %v454_v35 }
  0x2c   : > { %457 = vst [vmem:[%s2491_s24 + $0x20] sm:$0xff] %v456_v36  ;;  %459 = vst [vmem:[%s2491_s24 + $0x28] sm:$0xff] %v458_v37  ;;  %v460_v38 = vld [vmem:[%s2486_s14 + $0x60] sm:$0xff]  ;;  %v462_v39 = vld [vmem:[%s2486_s14 + $0x70] sm:$0xff] }
  0x2d   : > { %v464_v40 = vld [vmem:[%s2486_s14 + $0x80] sm:$0xff]  ;;  %461 = vst [vmem:[%s2491_s24 + $0x30] sm:$0xff] %v460_v38  ;;  %463 = vst [vmem:[%s2491_s24 + $0x38] sm:$0xff] %v462_v39  ;;  %v466_v41 = vld [vmem:[%s2486_s14 + $0x90] sm:$0xff] }
  0x2e   : > { %465 = vst [vmem:[%s2491_s24 + $0x40] sm:$0xff] %v464_v40  ;;  %v468_v42 = vld [vmem:[%s2486_s14 + $0xa0] sm:$0xff]  ;;  %v470_v43 = vld [vmem:[%s2486_s14 + $0xb0] sm:$0xff]  ;;  %467 = vst [vmem:[%s2491_s24 + $0x48] sm:$0xff] %v466_v41 }
  0x2f   : > { %469 = vst [vmem:[%s2491_s24 + $0x50] sm:$0xff] %v468_v42  ;;  %471 = vst [vmem:[%s2491_s24 + $0x58] sm:$0xff] %v470_v43  ;;  %v472_v44 = vld [vmem:[%s2486_s14 + $0xc0] sm:$0xff]  ;;  %v474_v45 = vld [vmem:[%s2486_s14 + $0xd0] sm:$0xff] }
  0x30   : > { %v476_v46 = vld [vmem:[%s2486_s14 + $0xe0] sm:$0xff]  ;;  %473 = vst [vmem:[%s2491_s24 + $0x60] sm:$0xff] %v472_v44  ;;  %475 = vst [vmem:[%s2491_s24 + $0x68] sm:$0xff] %v474_v45  ;;  %v478_v47 = vld [vmem:[%s2486_s14 + $0xf0] sm:$0xff] }
  0x31   : > { %477 = vst [vmem:[%s2491_s24 + $0x70] sm:$0xff] %v476_v46  ;;  %v480_v48 = vld [vmem:[%s2486_s14 + $0x100] sm:$0xff]  ;;  %v482_v49 = vld [vmem:[%s2486_s14 + $0x110] sm:$0xff]  ;;  %479 = vst [vmem:[%s2491_s24 + $0x78] sm:$0xff] %v478_v47 }
  0x32   : > { %481 = vst [vmem:[%s2491_s24 + $0x80] sm:$0xff] %v480_v48  ;;  %483 = vst [vmem:[%s2491_s24 + $0x88] sm:$0xff] %v482_v49  ;;  %v484_v50 = vld [vmem:[%s2486_s14 + $0x120] sm:$0xff]  ;;  %v486_v51 = vld [vmem:[%s2486_s14 + $0x130] sm:$0xff] }
  0x33   : > { %v488_v52 = vld [vmem:[%s2486_s14 + $0x140] sm:$0xff]  ;;  %485 = vst [vmem:[%s2491_s24 + $0x90] sm:$0xff] %v484_v50  ;;  %487 = vst [vmem:[%s2491_s24 + $0x98] sm:$0xff] %v486_v51  ;;  %v490_v53 = vld [vmem:[%s2486_s14 + $0x150] sm:$0xff] }
  0x34   : > { %489 = vst [vmem:[%s2491_s24 + $0xa0] sm:$0xff] %v488_v52  ;;  %v492_v54 = vld [vmem:[%s2486_s14 + $0x160] sm:$0xff]  ;;  %v494_v55 = vld [vmem:[%s2486_s14 + $0x170] sm:$0xff]  ;;  %491 = vst [vmem:[%s2491_s24 + $0xa8] sm:$0xff] %v490_v53 }
  0x35   : > { %493 = vst [vmem:[%s2491_s24 + $0xb0] sm:$0xff] %v492_v54  ;;  %495 = vst [vmem:[%s2491_s24 + $0xb8] sm:$0xff] %v494_v55  ;;  %v496_v56 = vld [vmem:[%s2486_s14 + $0x180] sm:$0xff]  ;;  %v498_v57 = vld [vmem:[%s2486_s14 + $0x190] sm:$0xff] }
  0x36   : > { %v500_v58 = vld [vmem:[%s2486_s14 + $0x1a0] sm:$0xff]  ;;  %497 = vst [vmem:[%s2491_s24 + $0xc0] sm:$0xff] %v496_v56  ;;  %499 = vst [vmem:[%s2491_s24 + $0xc8] sm:$0xff] %v498_v57  ;;  %v502_v59 = vld [vmem:[%s2486_s14 + $0x1b0] sm:$0xff] }
  0x37   : > { %501 = vst [vmem:[%s2491_s24 + $0xd0] sm:$0xff] %v500_v58  ;;  %v504_v60 = vld [vmem:[%s2486_s14 + $0x1c0] sm:$0xff]  ;;  %v506_v61 = vld [vmem:[%s2486_s14 + $0x1d0] sm:$0xff]  ;;  %503 = vst [vmem:[%s2491_s24 + $0xd8] sm:$0xff] %v502_v59 }
  0x38   : > { %505 = vst [vmem:[%s2491_s24 + $0xe0] sm:$0xff] %v504_v60  ;;  %507 = vst [vmem:[%s2491_s24 + $0xe8] sm:$0xff] %v506_v61  ;;  %v508_v62 = vld [vmem:[%s2486_s14 + $0x1e0] sm:$0xff]  ;;  %v510_v63 = vld [vmem:[%s2486_s14 + $0x1f0] sm:$0xff] }
  0x39   : > { %509 = vst [vmem:[%s2491_s24 + $0xf0] sm:$0xff] %v508_v62  ;;  %511 = vst [vmem:[%s2491_s24 + $0xf8] sm:$0xff] %v510_v63 }
  0x3a PF: > { %p1816_p7 = scmp.ge.s32.totalorder %s2320_s21, 1  ;;  %p526_p8 = scmp.lt.s32.totalorder %s2320_s21, 5 }
  0x3c   : > { %p527_p9 = pnand %p1816_p7, %p526_p8 }
  0x3d   : > { %s533_s25 = sand.u32 (!%p527_p9), 1, %s2296_s15   ;;  %s1819_s26 = sshll.u32 (!%p527_p9), %s2308_s18, 3 }
  0x3e   : > { %530 = sbr.rel (%p527_p9) target bundleno = 623 (0x26f), region = 104  ;;  %s1817_s28 = sshll.u32 (!%p527_p9), %s533_s25, 8 }
  0x3f   : > { %p583_p10 = scmp.lt.s32.totalorder (!%p527_p9), %s1819_s26, 15  ;;  %s1822_s29 = sshll.u32 (!%p527_p9), %s2304_s17, 5 }
  0x40   : > { %p592_p11 = scmp.lt.s32.totalorder (!%p527_p9), %s1822_s29, 63  ;;  %s2574_s14 = scalar_lea.vmem (!%p527_p9), [#allocation3], %s1817_s28 }
  0x41   : > { %s2576_s24 = scalar_lea.vmem (!%p527_p9), [#allocation4], %s1817_s28  ;;  %p1828_p12 = scmp.ne.s32.totalorder (!%p527_p9), %s2304_s17, 0 }
  0x43   : > { %s2825_s26 = smov (!%p583_p10, %s1819_s26), 15  ;;  %s2827_s29 = smov (!%p592_p11, %s1822_s29), 63 }
  0x44   : > { %s1954_s30 = sshll.u32 %s2825_s26, 3  ;;  %s1956_s8 = sshll.u32 %s2825_s26, 4 }
  0x45   : > { %s2562_s7 = scalar_lea.vmem %s2806_s0, %s1954_s30  ;;  %s2567_s11 = scalar_lea.vmem %s2810_s4, %s1956_s8 }
  0x46   : > { %s1955_s15 = sshll.u32 %s2827_s29, 3  ;;  %608 = sbr.rel (%p1828_p12) target bundleno = 84 (0x54), region = 116 }
  0x47   : > { %s2572_s13 = scalar_lea.vmem %s2809_s3, %s1955_s15 }
  0x4b   : > { %v2322_v0 = vmov 0.0  }
  0x4c   : > { %609 = vst [vmem:[#allocation2 + $0x30] sm:$0xff] %v2322_v0  ;;  %610 = vst [vmem:[#allocation2] sm:$0xff] %v2322_v0 }
  0x4d   : > { %611 = vst [vmem:[#allocation2 + $0x58] sm:$0xff] %v2322_v0  ;;  %612 = vst [vmem:[#allocation2 + $0x18] sm:$0xff] %v2322_v0 }
  0x4e   : > { %613 = vst [vmem:[#allocation2 + $0x50] sm:$0xff] %v2322_v0  ;;  %614 = vst [vmem:[#allocation2 + $0x68] sm:$0xff] %v2322_v0 }
  0x4f   : > { %615 = vst [vmem:[#allocation2 + $0x8] sm:$0xff] %v2322_v0  ;;  %616 = vst [vmem:[#allocation2 + $0x48] sm:$0xff] %v2322_v0 }
  0x50   : > { %617 = vst [vmem:[#allocation2 + $0x40] sm:$0xff] %v2322_v0  ;;  %618 = vst [vmem:[#allocation2 + $0x20] sm:$0xff] %v2322_v0 }
  0x51   : > { %619 = vst [vmem:[#allocation2 + $0x10] sm:$0xff] %v2322_v0  ;;  %620 = vst [vmem:[#allocation2 + $0x38] sm:$0xff] %v2322_v0 }
  0x52   : > { %621 = vst [vmem:[#allocation2 + $0x60] sm:$0xff] %v2322_v0  ;;  %622 = vst [vmem:[#allocation2 + $0x70] sm:$0xff] %v2322_v0 }
  0x53   : > { %623 = vst [vmem:[#allocation2 + $0x78] sm:$0xff] %v2322_v0  ;;  %624 = vst [vmem:[#allocation2 + $0x28] sm:$0xff] %v2322_v0 }
  0x54 PF: > { %v2046_v1 = vld [vmem:[%s2574_s14 + $0x74] ss:$8 sps:$4 sm:$0xff]   ;;  %v2048_v2 = vld [vmem:[%s2574_s14 + $0x70] ss:$8 sps:$4 sm:$0xff]   ;;  %v2049_v3 = vld [vmem:[%s2574_s14 + $0x64] ss:$8 sps:$4 sm:$0xff]  }
  0x55   : > { %865 = vmatprep.subr.bf16.mxu0 %v2046_v1  ;;  %v2051_v4 = vld [vmem:[%s2574_s14 + $0x60] ss:$8 sps:$4 sm:$0xff]   ;;  %v2052_v5 = vld [vmem:[%s2574_s14 + $0x54] ss:$8 sps:$4 sm:$0xff]   ;;  %v2054_v6 = vld [vmem:[%s2574_s14 + $0x50] ss:$8 sps:$4 sm:$0xff]  }
  0x56   : > { %866 = vmatpush1.bf16.msra.mxu0 %v2048_v2  ;;  %v2055_v7 = vld [vmem:[%s2574_s14 + $0x44] ss:$8 sps:$4 sm:$0xff]   ;;  %v2057_v8 = vld [vmem:[%s2574_s14 + $0x40] ss:$8 sps:$4 sm:$0xff]   ;;  %v2069_v9 = vld [vmem:[%s2576_s24 + $0x74] ss:$8 sps:$4 sm:$0xff]  }
  0x57   : > { %867 = vmatprep.subr.bf16.mxu0 %v2049_v3  ;;  %v2072_v10 = vld [vmem:[%s2576_s24 + $0x70] ss:$8 sps:$4 sm:$0xff]   ;;  %v2058_v11 = vld [vmem:[%s2574_s14 + $0x34] ss:$8 sps:$4 sm:$0xff]   ;;  %1130 = vmatprep.subr.bf16.mxu1 %v2069_v9  ;;  %v2075_v12 = vld [vmem:[%s2576_s24 + $0x64] ss:$8 sps:$4 sm:$0xff]  }
  0x58   : > { %1131 = vmatpush1.bf16.msra.mxu1 %v2072_v10  ;;  %v2078_v13 = vld [vmem:[%s2576_s24 + $0x60] ss:$8 sps:$4 sm:$0xff]   ;;  %v2060_v14 = vld [vmem:[%s2574_s14 + $0x30] ss:$8 sps:$4 sm:$0xff]   ;;  %v2061_v15 = vld [vmem:[%s2574_s14 + $0x24] ss:$8 sps:$4 sm:$0xff]  }
  0x59   : > { %1132 = vmatprep.subr.bf16.mxu1 %v2075_v12  ;;  %v2081_v16 = vld [vmem:[%s2576_s24 + $0x54] ss:$8 sps:$4 sm:$0xff]   ;;  %v2084_v17 = vld [vmem:[%s2576_s24 + $0x50] ss:$8 sps:$4 sm:$0xff]   ;;  %v2063_v18 = vld [vmem:[%s2574_s14 + $0x20] ss:$8 sps:$4 sm:$0xff]  }
  0x5a   : > { %868 = vmatpush1.bf16.msra.mxu0 %v2051_v4  ;;  %v2087_v19 = vld [vmem:[%s2576_s24 + $0x44] ss:$8 sps:$4 sm:$0xff]   ;;  %v2064_v20 = vld [vmem:[%s2574_s14 + $0x14] ss:$8 sps:$4 sm:$0xff]   ;;  %v2066_v21 = vld [vmem:[%s2574_s14 + $0x10] ss:$8 sps:$4 sm:$0xff]  }
  0x5b   : > { %869 = vmatprep.subr.bf16.mxu0 %v2052_v5  ;;  %v2090_v22 = vld [vmem:[%s2576_s24 + $0x40] ss:$8 sps:$4 sm:$0xff]   ;;  %v2093_v23 = vld [vmem:[%s2576_s24 + $0x34] ss:$8 sps:$4 sm:$0xff]   ;;  %v2067_v24 = vld [vmem:[%s2574_s14 + $0x4] ss:$8 sps:$4 sm:$0xff]  }
  0x5c   : > { %1133 = vmatpush1.bf16.msra.mxu1 %v2078_v13  ;;  %v2096_v25 = vld [vmem:[%s2576_s24 + $0x30] ss:$8 sps:$4 sm:$0xff]   ;;  %v2071_v26 = vld [vmem:[%s2574_s14] ss:$8 sps:$4 sm:$0xff]   ;;  %v2099_v27 = vld [vmem:[%s2576_s24 + $0x24] ss:$8 sps:$4 sm:$0xff]  }
  0x5d   : > { %1134 = vmatprep.subr.bf16.mxu1 %v2081_v16  ;;  %v2073_v28 = vld [vmem:[%s2574_s14 + $0xf4] ss:$8 sps:$4 sm:$0xff]   ;;  %v2077_v29 = vld [vmem:[%s2574_s14 + $0xf0] ss:$8 sps:$4 sm:$0xff]   ;;  %v2102_v30 = vld [vmem:[%s2576_s24 + $0x20] ss:$8 sps:$4 sm:$0xff]  }
  0x5e   : > { %870 = vmatpush1.bf16.msra.mxu0 %v2054_v6  ;;  %v2105_v31 = vld [vmem:[%s2576_s24 + $0x14] ss:$8 sps:$4 sm:$0xff]   ;;  %v2079_v32 = vld [vmem:[%s2574_s14 + $0xe4] ss:$8 sps:$4 sm:$0xff]   ;;  %v2108_v33 = vld [vmem:[%s2576_s24 + $0x10] ss:$8 sps:$4 sm:$0xff]  }
  0x5f   : > { %871 = vmatprep.subr.bf16.mxu0 %v2055_v7  ;;  %v2123_v34 = vld [vmem:[%s2562_s7 + $0x4] ss:$8 sps:$4 sm:$0xff]   ;;  %v2083_v35 = vld [vmem:[%s2574_s14 + $0xe0] ss:$8 sps:$4 sm:$0xff]   ;;  %v2085_v37 = vld [vmem:[%s2574_s14 + $0xd4] ss:$8 sps:$4 sm:$0xff]  }
  0x60   : > { %1135 = vmatpush1.bf16.msra.mxu1 %v2084_v17  ;;  %v2111_v36 = vld [vmem:[%s2576_s24 + $0x4] ss:$8 sps:$4 sm:$0xff]   ;;  %897 = vmatprep.mubr.bf16.mxu0 %v2123_v34  ;;  %v2114_v38 = vld [vmem:[%s2576_s24] ss:$8 sps:$4 sm:$0xff]   ;;  %v2089_v39 = vld [vmem:[%s2574_s14 + $0xd0] ss:$8 sps:$4 sm:$0xff]  }
  0x61   : > { %1136 = vmatprep.subr.bf16.mxu1 %v2087_v19  ;;  %1162 = vmatprep.mubr.bf16.mxu1 %v2123_v34  ;;  %v2117_v40 = vld [vmem:[%s2576_s24 + $0xf4] ss:$8 sps:$4 sm:$0xff]   ;;  %v2091_v41 = vld [vmem:[%s2574_s14 + $0xc4] ss:$8 sps:$4 sm:$0xff]   ;;  %v2120_v42 = vld [vmem:[%s2576_s24 + $0xf0] ss:$8 sps:$4 sm:$0xff]  }
  0x62   : > { %872 = vmatpush1.bf16.msra.mxu0 %v2057_v8  ;;  %v2095_v43 = vld [vmem:[%s2574_s14 + $0xc0] ss:$8 sps:$4 sm:$0xff]   ;;  %v2124_v44 = vld [vmem:[%s2576_s24 + $0xe4] ss:$8 sps:$4 sm:$0xff]   ;;  %v2097_v45 = vld [vmem:[%s2574_s14 + $0xb4] ss:$8 sps:$4 sm:$0xff]  }
  0x63   : > { %873 = vmatprep.subr.bf16.mxu0 %v2058_v11  ;;  %v2126_v46 = vld [vmem:[%s2576_s24 + $0xe0] ss:$8 sps:$4 sm:$0xff]   ;;  %v2101_v47 = vld [vmem:[%s2574_s14 + $0xb0] ss:$8 sps:$4 sm:$0xff]   ;;  %v2127_v48 = vld [vmem:[%s2576_s24 + $0xd4] ss:$8 sps:$4 sm:$0xff]  }
  0x64   : > { %1137 = vmatpush1.bf16.msra.mxu1 %v2090_v22  ;;  %v2103_v49 = vld [vmem:[%s2574_s14 + $0xa4] ss:$8 sps:$4 sm:$0xff]   ;;  %v2129_v50 = vld [vmem:[%s2576_s24 + $0xd0] ss:$8 sps:$4 sm:$0xff]   ;;  %v2107_v51 = vld [vmem:[%s2574_s14 + $0xa0] ss:$8 sps:$4 sm:$0xff]  }
  0x65   : > { %1138 = vmatprep.subr.bf16.mxu1 %v2093_v23  ;;  %v2133_v52 = vld [vmem:[%s2576_s24 + $0xc4] ss:$8 sps:$4 sm:$0xff]   ;;  %v2109_v53 = vld [vmem:[%s2574_s14 + $0x94] ss:$8 sps:$4 sm:$0xff]   ;;  %v2113_v54 = vld [vmem:[%s2574_s14 + $0x90] ss:$8 sps:$4 sm:$0xff]  }
  0x66   : > { %874 = vmatpush1.bf16.msra.mxu0 %v2060_v14  ;;  %v2115_v55 = vld [vmem:[%s2574_s14 + $0x84] ss:$8 sps:$4 sm:$0xff]   ;;  %v2135_v56 = vld [vmem:[%s2576_s24 + $0xc0] ss:$8 sps:$4 sm:$0xff]   ;;  %v2136_v57 = vld [vmem:[%s2576_s24 + $0xb4] ss:$8 sps:$4 sm:$0xff]  }
  0x67   : > { %875 = vmatprep.subr.bf16.mxu0 %v2061_v15  ;;  %v2138_v58 = vld [vmem:[%s2576_s24 + $0xb0] ss:$8 sps:$4 sm:$0xff]   ;;  %v2119_v59 = vld [vmem:[%s2574_s14 + $0x80] ss:$8 sps:$4 sm:$0xff]   ;;  %v2142_v60 = vld [vmem:[%s2576_s24 + $0xa4] ss:$8 sps:$4 sm:$0xff]  }
  0x68   : > { %1139 = vmatpush1.bf16.msra.mxu1 %v2096_v25  ;;  %v2156_v61 = vld [vmem:[%s2572_s13 + $0x74] ss:$8 sps:$4 sm:$0xff]   ;;  %v2121_v62 = vld [vmem:[%s2562_s7] ss:$8 sps:$4 sm:$0xff]   ;;  %v2154_v2 = vld [vmem:[%s2572_s13 + $0x70] ss:$8 sps:$4 sm:$0xff]  }
  0x69   : > { %1140 = vmatprep.subr.bf16.mxu1 %v2099_v27  ;;  %v2144_v63 = vld [vmem:[%s2576_s24 + $0xa0] ss:$8 sps:$4 sm:$0xff]   ;;  %v2130_v0 = vld [vmem:[%s2562_s7 + $0x14] ss:$8 sps:$4 sm:$0xff]   ;;  %v2159_v3 = vld [vmem:[%s2572_s13 + $0x64] ss:$8 sps:$4 sm:$0xff]  }
  0x6a   : > { %876 = vmatpush1.bf16.msra.mxu0 %v2063_v18  ;;  %v2145_v1 = vld [vmem:[%s2576_s24 + $0x94] ss:$8 sps:$4 sm:$0xff]   ;;  %v2147_v4 = vld [vmem:[%s2576_s24 + $0x90] ss:$8 sps:$4 sm:$0xff]   ;;  %v2151_v5 = vld [vmem:[%s2576_s24 + $0x84] ss:$8 sps:$4 sm:$0xff]  }
  0x6b   : > { %877 = vmatprep.subr.bf16.mxu0 %v2064_v20  ;;  %v2157_v6 = vld [vmem:[%s2572_s13 + $0x60] ss:$8 sps:$4 sm:$0xff]   ;;  %v2162_v7 = vld [vmem:[%s2572_s13 + $0x54] ss:$8 sps:$4 sm:$0xff]   ;;  %v2132_v8 = vld [vmem:[%s2562_s7 + $0x10] ss:$8 sps:$4 sm:$0xff]  }
  0x6c   : > { %1141 = vmatpush1.bf16.msra.mxu1 %v2102_v30  ;;  %v2153_v9 = vld [vmem:[%s2576_s24 + $0x80] ss:$8 sps:$4 sm:$0xff]   ;;  %v2139_v10 = vld [vmem:[%s2562_s7 + $0x24] ss:$8 sps:$4 sm:$0xff]   ;;  %v2160_v11 = vld [vmem:[%s2572_s13 + $0x50] ss:$8 sps:$4 sm:$0xff]  }
  0x6d   : > { %1142 = vmatprep.subr.bf16.mxu1 %v2105_v31  ;;  %v2165_v12 = vld [vmem:[%s2572_s13 + $0x44] ss:$8 sps:$4 sm:$0xff]   ;;  %v2163_v13 = vld [vmem:[%s2572_s13 + $0x40] ss:$8 sps:$4 sm:$0xff]   ;;  %v2168_v14 = vld [vmem:[%s2572_s13 + $0x34] ss:$8 sps:$4 sm:$0xff]  }
  0x6e   : > { %878 = vmatpush1.bf16.msra.mxu0 %v2066_v21  ;;  %v2141_v15 = vld [vmem:[%s2562_s7 + $0x20] ss:$8 sps:$4 sm:$0xff]   ;;  %v2148_v16 = vld [vmem:[%s2562_s7 + $0x34] ss:$8 sps:$4 sm:$0xff]   ;;  %v2166_v17 = vld [vmem:[%s2572_s13 + $0x30] ss:$8 sps:$4 sm:$0xff]  }
  0x6f   : > { %879 = vmatprep.subr.bf16.mxu0 %v2067_v24  ;;  %v2150_v18 = vld [vmem:[%s2562_s7 + $0x30] ss:$8 sps:$4 sm:$0xff]   ;;  %v2171_v19 = vld [vmem:[%s2572_s13 + $0x24] ss:$8 sps:$4 sm:$0xff]   ;;  %v2169_v20 = vld [vmem:[%s2572_s13 + $0x20] ss:$8 sps:$4 sm:$0xff]  }
  0x70   : > { %1143 = vmatpush1.bf16.msra.mxu1 %v2108_v33  ;;  %v2174_v21 = vld [vmem:[%s2572_s13 + $0x14] ss:$8 sps:$4 sm:$0xff]   ;;  %v2172_v22 = vld [vmem:[%s2572_s13 + $0x10] ss:$8 sps:$4 sm:$0xff]   ;;  %v2177_v23 = vld [vmem:[%s2572_s13 + $0x4] ss:$8 sps:$4 sm:$0xff]  }
  0x71   : > { %1144 = vmatprep.subr.bf16.mxu1 %v2111_v36  ;;  %v2175_v24 = vld [vmem:[%s2572_s13] ss:$8 sps:$4 sm:$0xff]   ;;  %v2180_v25 = vld [vmem:[%s2572_s13 + $0xf4] ss:$8 sps:$4 sm:$0xff]   ;;  %v2183_v27 = vld [vmem:[%s2572_s13 + $0xe4] ss:$8 sps:$4 sm:$0xff]  }
  0x72   : > { %880 = vmatpush1.bf16.msra.mxu0 %v2071_v26  ;;  %v2178_v26 = vld [vmem:[%s2572_s13 + $0xf0] ss:$8 sps:$4 sm:$0xff]   ;;  %v2189_v31 = vld [vmem:[%s2572_s13 + $0xc4] ss:$8 sps:$4 sm:$0xff]   ;;  %v2192_v33 = vld [vmem:[%s2572_s13 + $0xb4] ss:$8 sps:$4 sm:$0xff]  }
  0x73   : > { %881 = vmatprep.subr.bf16.mxu0 %v2073_v28  ;;  %v2181_v28 = vld [vmem:[%s2572_s13 + $0xe0] ss:$8 sps:$4 sm:$0xff]   ;;  %v2184_v30 = vld [vmem:[%s2572_s13 + $0xd0] ss:$8 sps:$4 sm:$0xff]   ;;  %p1949_p13 = scmp.ne.s32.totalorder %s2304_s17, 1 }
  0x74   : > { %1145 = vmatpush1.bf16.msra.mxu1 %v2114_v38  ;;  %v2190_v34 = vld [vmem:[%s2572_s13 + $0xb0] ss:$8 sps:$4 sm:$0xff]   ;;  %v2193_v36 = vld [vmem:[%s2572_s13 + $0xa0] ss:$8 sps:$4 sm:$0xff]  }
  0x75   : > { %1146 = vmatprep.subr.bf16.mxu1 %v2117_v40  ;;  %v2196_v38 = vld [vmem:[%s2572_s13 + $0x90] ss:$8 sps:$4 sm:$0xff]   ;;  %v2199_v40 = vld [vmem:[%s2572_s13 + $0x80] ss:$8 sps:$4 sm:$0xff]  }
  0x76   : > { %882 = vmatpush2.bf16.msra.mxu0 %v2077_v29  ;;  %v2186_v29 = vld [vmem:[%s2572_s13 + $0xd4] ss:$8 sps:$4 sm:$0xff]  }
  0x77   : > { %883 = vmatprep.subr.bf16.mxu0 %v2079_v32  ;;  %v2187_v32 = vld [vmem:[%s2572_s13 + $0xc0] ss:$8 sps:$4 sm:$0xff]  }
  0x78   : > { %1147 = vmatpush2.bf16.msra.mxu1 %v2120_v42 }
  0x79   : > { %1148 = vmatprep.subr.bf16.mxu1 %v2124_v44 }
  0x7a   : > { %884 = vmatpush2.bf16.msra.mxu0 %v2083_v35  ;;  %v2195_v35 = vld [vmem:[%s2572_s13 + $0xa4] ss:$8 sps:$4 sm:$0xff]  }
  0x7b   : > { %885 = vmatprep.subr.bf16.mxu0 %v2085_v37  ;;  %v2198_v37 = vld [vmem:[%s2572_s13 + $0x94] ss:$8 sps:$4 sm:$0xff]  }
  0x7c   : > { %1149 = vmatpush2.bf16.msra.mxu1 %v2126_v46 }
  0x7d   : > { %1150 = vmatprep.subr.bf16.mxu1 %v2127_v48 }
  0x7e   : > { %886 = vmatpush2.bf16.msra.mxu0 %v2089_v39  ;;  %v2201_v39 = vld [vmem:[%s2572_s13 + $0x84] ss:$8 sps:$4 sm:$0xff]  }
  0x7f   : > { %887 = vmatprep.subr.bf16.mxu0 %v2091_v41 }
  0x80   : > { %1151 = vmatpush2.bf16.msra.mxu1 %v2129_v50 }
  0x81   : > { %1152 = vmatprep.subr.bf16.mxu1 %v2133_v52 }
  0x82   : > { %888 = vmatpush2.bf16.msra.mxu0 %v2095_v43 }
  0x83   : > { %889 = vmatprep.subr.bf16.mxu0 %v2097_v45 }
  0x84   : > { %1153 = vmatpush2.bf16.msra.mxu1 %v2135_v56 }
  0x85   : > { %1154 = vmatprep.subr.bf16.mxu1 %v2136_v57 }
  0x86   : > { %890 = vmatpush2.bf16.msra.mxu0 %v2101_v47 }
  0x87   : > { %891 = vmatprep.subr.bf16.mxu0 %v2103_v49 }
  0x88   : > { %1155 = vmatpush2.bf16.msra.mxu1 %v2138_v58 }
  0x89   : > { %1156 = vmatprep.subr.bf16.mxu1 %v2142_v60 }
  0x8a   : > { %892 = vmatpush2.bf16.msra.mxu0 %v2107_v51 }
  0x8b   : > { %893 = vmatprep.subr.bf16.mxu0 %v2109_v53 }
  0x8c   : > { %1157 = vmatpush2.bf16.msra.mxu1 %v2144_v63 }
  0x8d   : > { %1158 = vmatprep.subr.bf16.mxu1 %v2145_v1 }
  0x8e   : > { %894 = vmatpush2.bf16.msra.mxu0 %v2113_v54 }
  0x8f   : > { %895 = vmatprep.subr.bf16.mxu0 %v2115_v55 }
  0x90   : > { %1159 = vmatpush2.bf16.msra.mxu1 %v2147_v4 }
  0x91   : > { %1160 = vmatprep.subr.bf16.mxu1 %v2151_v5 }
  0x92   : > { %896 = vmatpush2.bf16.msra.mxu0 %v2119_v59 }
  0x93   : > { %1547 = vmatprep.subr.bf16.mxu0 %v2156_v61 }
  0x94   : > { %1161 = vmatpush2.bf16.msra.mxu1 %v2153_v9 }
  0x95   : > { %898 = vmatmul.mubr.bf16.vlgmr.msra.gmra.mxu0 %v2121_v62  ;;  %1957 = vmatprep.subr.bf16.mxu1 %v2156_v61 }
  0x96   : > { %907 = vmatprep.mubr.bf16.mxu0 %v2130_v0  ;;  %1548 = vmatpush1.bf16.msra.mxu0 %v2154_v2 }
  0x97   : > { %1549 = vmatprep.subr.bf16.mxu0 %v2159_v3  ;;  %1163 = vmatmul.mubr.bf16.vlgmr.msra.gmra.mxu1 %v2121_v62 }
  0x98   : > { %1172 = vmatprep.mubr.bf16.mxu1 %v2130_v0  ;;  %1973 = vmatpush1.bf16.msra.mxu1 %v2154_v2 }
  0x99   : > { %1958 = vmatprep.subr.bf16.mxu1 %v2159_v3 }
  0x9a   : > { %1550 = vmatpush1.bf16.msra.mxu0 %v2157_v6 }
  0x9b   : > { %1551 = vmatprep.subr.bf16.mxu0 %v2162_v7 }
  0x9c   : > { %1974 = vmatpush1.bf16.msra.mxu1 %v2157_v6 }
  0x9d   : > { %908 = vmatmul.mubr.bf16.gmra.mxu0 %v2132_v8  ;;  %1959 = vmatprep.subr.bf16.mxu1 %v2162_v7 }
  0x9e   : > { %917 = vmatprep.mubr.bf16.mxu0 %v2139_v10  ;;  %1552 = vmatpush1.bf16.msra.mxu0 %v2160_v11 }
  0x9f   : > { %1553 = vmatprep.subr.bf16.mxu0 %v2165_v12  ;;  %1173 = vmatmul.mubr.bf16.gmra.mxu1 %v2132_v8 }
  0xa0   : > { %1182 = vmatprep.mubr.bf16.mxu1 %v2139_v10  ;;  %1975 = vmatpush1.bf16.msra.mxu1 %v2160_v11 }
  0xa1   : > { %1960 = vmatprep.subr.bf16.mxu1 %v2165_v12 }
  0xa2   : > { %1554 = vmatpush1.bf16.msra.mxu0 %v2163_v13 }
  0xa3   : > { %1555 = vmatprep.subr.bf16.mxu0 %v2168_v14 }
  0xa4   : > { %1976 = vmatpush1.bf16.msra.mxu1 %v2163_v13 }
  0xa5   : > { %918 = vmatmul.mubr.bf16.gmra.mxu0 %v2141_v15  ;;  %1961 = vmatprep.subr.bf16.mxu1 %v2168_v14 }
  0xa6   : > { %927 = vmatprep.mubr.bf16.mxu0 %v2148_v16  ;;  %1556 = vmatpush1.bf16.msra.mxu0 %v2166_v17 }
  0xa7   : > { %1183 = vmatmul.mubr.bf16.gmra.mxu1 %v2141_v15  ;;  %1557 = vmatprep.subr.bf16.mxu0 %v2171_v19 }
  0xa8   : > { %1192 = vmatprep.mubr.bf16.mxu1 %v2148_v16  ;;  %1977 = vmatpush1.bf16.msra.mxu1 %v2166_v17 }
  0xa9   : > { %1962 = vmatprep.subr.bf16.mxu1 %v2171_v19 }
  0xaa   : > { %1558 = vmatpush1.bf16.msra.mxu0 %v2169_v20 }
  0xab   : > { %1559 = vmatprep.subr.bf16.mxu0 %v2174_v21 }
  0xac   : > { %1978 = vmatpush1.bf16.msra.mxu1 %v2169_v20 }
  0xad   : > { %928 = vmatmul.mubr.bf16.gmra.mxu0 %v2150_v18  ;;  %1963 = vmatprep.subr.bf16.mxu1 %v2174_v21 }
  0xae   : > { %1560 = vmatpush1.bf16.msra.mxu0 %v2172_v22 }
  0xaf   : > { %1193 = vmatmul.mubr.bf16.gmra.mxu1 %v2150_v18  ;;  %1561 = vmatprep.subr.bf16.mxu0 %v2177_v23 }
  0xb0   : > { %1979 = vmatpush1.bf16.msra.mxu1 %v2172_v22 }
  0xb1   : > { %1964 = vmatprep.subr.bf16.mxu1 %v2177_v23 }
  0xb2   : > { %1562 = vmatpush1.bf16.msra.mxu0 %v2175_v24 }
  0xb3   : > { %1563 = vmatprep.subr.bf16.mxu0 %v2180_v25 }
  0xb4   : > { %1980 = vmatpush1.bf16.msra.mxu1 %v2175_v24 }
  0xb5   : > { %1965 = vmatprep.subr.bf16.mxu1 %v2180_v25 }
  0xb6   : > { %1564 = vmatpush2.bf16.msra.mxu0 %v2178_v26 }
  0xb7   : > { %1565 = vmatprep.subr.bf16.mxu0 %v2183_v27 }
  0xb8   : > { %1981 = vmatpush2.bf16.msra.mxu1 %v2178_v26 }
  0xb9   : > { %1966 = vmatprep.subr.bf16.mxu1 %v2183_v27 }
  0xba   : > { %1566 = vmatpush2.bf16.msra.mxu0 %v2181_v28 }
  0xbb   : > { %1567 = vmatprep.subr.bf16.mxu0 %v2186_v29 }
  0xbc   : > { %1982 = vmatpush2.bf16.msra.mxu1 %v2181_v28 }
  0xbd   : > { %1967 = vmatprep.subr.bf16.mxu1 %v2186_v29 }
  0xbe   : > { %1568 = vmatpush2.bf16.msra.mxu0 %v2184_v30 }
  0xbf   : > { %1569 = vmatprep.subr.bf16.mxu0 %v2189_v31 }
  0xc0   : > { %1983 = vmatpush2.bf16.msra.mxu1 %v2184_v30 }
  0xc1   : > { %1968 = vmatprep.subr.bf16.mxu1 %v2189_v31 }
  0xc2   : > { %1570 = vmatpush2.bf16.msra.mxu0 %v2187_v32 }
  0xc3   : > { %1571 = vmatprep.subr.bf16.mxu0 %v2192_v33 }
  0xc4   : > { %1984 = vmatpush2.bf16.msra.mxu1 %v2187_v32 }
  0xc5   : > { %1969 = vmatprep.subr.bf16.mxu1 %v2192_v33 }
  0xc6   : > { %1572 = vmatpush2.bf16.msra.mxu0 %v2190_v34 }
  0xc7   : > { %1573 = vmatprep.subr.bf16.mxu0 %v2195_v35 }
  0xc8   : > { %1985 = vmatpush2.bf16.msra.mxu1 %v2190_v34 }
  0xc9   : > { %1970 = vmatprep.subr.bf16.mxu1 %v2195_v35 }
  0xca   : > { %1574 = vmatpush2.bf16.msra.mxu0 %v2193_v36 }
  0xcb   : > { %1575 = vmatprep.subr.bf16.mxu0 %v2198_v37 }
  0xcc   : > { %1986 = vmatpush2.bf16.msra.mxu1 %v2193_v36 }
  0xcd   : > { %1971 = vmatprep.subr.bf16.mxu1 %v2198_v37 }
  0xce   : > { %1576 = vmatpush2.bf16.msra.mxu0 %v2196_v38 }
  0xcf   : > { %1577 = vmatprep.subr.bf16.mxu0 %v2201_v39 }
  0xd0   : > { %1987 = vmatpush2.bf16.msra.mxu1 %v2196_v38 }
  0xd1   : > { %1972 = vmatprep.subr.bf16.mxu1 %v2201_v39 }
  0xd2   : > { %1578 = vmatpush2.bf16.msra.mxu0 %v2199_v40 }
  0xd4   : > { %1988 = vmatpush2.bf16.msra.mxu1 %v2199_v40 }
 0x155   : > { %v2683_v41 = vpop.f32.mrf.mxu0 }
 0x156   : > { %v1901_v42 = vmul.f32 -1.442695, %v2683_v41 }
 0x157   : > { %v2686_v43 = vpop.f32.mrf.mxu0  ;;  %v2701_v53 = vpop.f32.mrf.mxu1 }
 0x158   : > { %2202 = vpow2.f32 %v1901_v42  ;;  %v1902_v44 = vmul.f32 -1.442695, %v2686_v43 }
 0x159   : > { %v2689_v45 = vpop.f32.mrf.mxu0  ;;  %v2706_v56 = vpop.f32.mrf.mxu1 }
 0x15a   : > { %2204 = vpow2.f32 %v1902_v44  ;;  %v1903_v46 = vmul.f32 -1.442695, %v2689_v45 }
 0x15b   : > { %v2692_v47 = vpop.f32.mrf.mxu0  ;;  %v2711_v59 = vpop.f32.mrf.mxu1 }
 0x15c   : > { %2206 = vpow2.f32 %v1903_v46  ;;  %v1904_v48 = vmul.f32 -1.442695, %v2692_v47 }
 0x15d   : > { %v2695_v49 = vpop.f32.mrf.mxu0  ;;  %v2716_v0 = vpop.f32.mrf.mxu1 }
 0x15e   : > { %2208 = vpow2.f32 %v1904_v48  ;;  %v1905_v50 = vmul.f32 -1.442695, %v2695_v49 }
 0x15f   : > { %v2698_v51 = vpop.f32.mrf.mxu0  ;;  %v2724_v9 = vpop.f32.mrf.mxu1 }
 0x160   : > { %2210 = vpow2.f32 %v1905_v50  ;;  %v1906_v52 = vmul.f32 -1.442695, %v2698_v51 }
 0x161   : > { %v2703_v54 = vpop.f32.mrf.mxu0  ;;  %v2732_v18 = vpop.f32.mrf.mxu1 }
 0x162   : > { %2212 = vpow2.f32 %v1906_v52  ;;  %v1907_v55 = vmul.f32 -1.442695, %v2703_v54 }
 0x163   : > { %v2708_v57 = vpop.f32.mrf.mxu0  ;;  %v1178_v27 = vpop.f32.mrf.mxu1 }
 0x164   : > { %2214 = vpow2.f32 %v1907_v55  ;;  %v1908_v58 = vmul.f32 -1.442695, %v2708_v57 }
 0x165   : > { %v2203_v60 = vpop.eup %2202  ;;  %v2713_v61 = vpop.f32.mrf.mxu0 }
 0x166   : > { %v1251_v62 = vadd.f32 1.0, %v2203_v60  ;;  %2216 = vpow2.f32 %v1908_v58  ;;  %v1909_v63 = vmul.f32 -1.442695, %v2713_v61  ;;  %v1180_v34 = vpop.f32.mrf.mxu1 }
 0x167   : > { %v2205_v1 = vpop.eup %2204  ;;  %v2718_v2 = vpop.f32.mrf.mxu0 }
 0x168   : > { %2218 = vrcp.f32 %v1251_v62  ;;  %v1252_v3 = vadd.f32 1.0, %v2205_v1  ;;  %v1910_v4 = vmul.f32 -1.442695, %v2718_v2  ;;  %v2745_v46 = vpop.f32.mrf.mxu1 }
 0x169   : > { %v2207_v5 = vpop.eup %2206  ;;  %2220 = vpow2.f32 %v1909_v63  ;;  %v2721_v6 = vpop.f32.mrf.mxu0 }
 0x16a   : > { %2222 = vrcp.f32 %v1252_v3  ;;  %v1253_v7 = vadd.f32 1.0, %v2207_v5  ;;  %v1911_v8 = vmul.f32 -1.442695, %v2721_v6  ;;  %v1186_v3 = vpop.f32.mrf.mxu1 }
 0x16b   : > { %v2209_v10 = vpop.eup %2208  ;;  %2224 = vpow2.f32 %v1910_v4  ;;  %v2726_v11 = vpop.f32.mrf.mxu0 }
 0x16c   : > { %2226 = vrcp.f32 %v1253_v7  ;;  %v1254_v12 = vadd.f32 1.0, %v2209_v10  ;;  %v1912_v13 = vmul.f32 -1.442695, %v2726_v11 }
 0x16d   : > { %v2211_v14 = vpop.eup %2210  ;;  %2228 = vpow2.f32 %v1911_v8  ;;  %v2729_v15 = vpop.f32.mrf.mxu0 }
 0x16e   : > { %2230 = vrcp.f32 %v1254_v12  ;;  %v1255_v16 = vadd.f32 1.0, %v2211_v14  ;;  %v1913_v17 = vmul.f32 -1.442695, %v2729_v15 }
 0x16f   : > { %v2213_v19 = vpop.eup %2212  ;;  %2232 = vpow2.f32 %v1912_v13  ;;  %v2734_v20 = vpop.f32.mrf.mxu0 }
 0x170   : > { %2234 = vrcp.f32 %v1255_v16  ;;  %v1256_v21 = vadd.f32 1.0, %v2213_v19  ;;  %v1914_v22 = vmul.f32 -1.442695, %v2734_v20 }
 0x171   : > { %v2215_v23 = vpop.eup %2214  ;;  %2236 = vpow2.f32 %v1913_v17  ;;  %v2737_v24 = vpop.f32.mrf.mxu0 }
 0x172   : > { %2238 = vrcp.f32 %v1256_v21  ;;  %v1257_v25 = vadd.f32 1.0, %v2215_v23  ;;  %v1915_v26 = vmul.f32 -1.442695, %v2737_v24 }
 0x173   : > { %v2217_v28 = vpop.eup %2216  ;;  %2240 = vpow2.f32 %v1914_v22  ;;  %v2740_v29 = vpop.f32.mrf.mxu0 }
 0x174   : > { %2242 = vrcp.f32 %v1257_v25  ;;  %v1258_v30 = vadd.f32 1.0, %v2217_v28  ;;  %v1916_v31 = vmul.f32 -1.442695, %v2740_v29 }
 0x175   : > { %v2219_v32 = vpop.eup %2218  ;;  %2244 = vpow2.f32 %v1915_v26 }
 0x176   : > { %v2221_v33 = vpop.eup %2220  ;;  %2246 = vrcp.f32 %v1258_v30  ;;  %v1299_v50 = vmul.f32 %v2219_v32, %v2683_v41 }
 0x177   : > { %v2223_v35 = vpop.eup %2222  ;;  %2248 = vpow2.f32 %v1916_v31  ;;  %v1259_v37 = vadd.f32 1.0, %v2221_v33 }
 0x178   : > { %v2225_v36 = vpop.eup %2224  ;;  %v1300_v42 = vmul.f32 %v2223_v35, %v2686_v43  ;;  %v1315_v41 = vmul.f32 %v1299_v50, %v2701_v53 }
 0x179   : > { %v2227_v38 = vpop.eup %2226  ;;  %v1260_v39 = vadd.f32 1.0, %v2225_v36 }
 0x17a   : > { %v2229_v40 = vpop.eup %2228  ;;  %v1301_v44 = vmul.f32 %v2227_v38, %v2689_v45  ;;  %v1316_v43 = vmul.f32 %v1300_v42, %v2706_v56  ;;  %v1188_v56 = vpop.f32.mrf.mxu1 }
 0x17b   : > { %v2231_v48 = vpop.eup %2230  ;;  %2250 = vrcp.f32 %v1260_v39  ;;  %v1261_v52 = vadd.f32 1.0, %v2229_v40 }
 0x17c   : > { %v2233_v55 = vpop.eup %2232  ;;  %v1302_v58 = vmul.f32 %v2231_v48, %v2692_v47  ;;  %2252 = vrcp.f32 %v1259_v37  ;;  %v1317_v63 = vmul.f32 %v1301_v44, %v2711_v59  ;;  %v1190_v25 = vpop.f32.mrf.mxu1 }
 0x17d   : > { %v2235_v60 = vpop.eup %2234  ;;  %2254 = vrcp.f32 %v1261_v52  ;;  %v1262_v62 = vadd.f32 1.0, %v2233_v55 }
 0x17e   : > { %v2237_v1 = vpop.eup %2236  ;;  %v1318_v45 = vmul.f32 %v1302_v58, %v2716_v0  ;;  %v1347_v12 = vpack.c.bf16 %v1317_v63, %v1315_v41  ;;  %v1303_v0 = vmul.f32 %v2235_v60, %v2695_v49  ;;  %v1194_v32 = vpop.f32.mrf.mxu1 }
 0x17f   : > { %v2239_v4 = vpop.eup %2238  ;;  %2256 = vrcp.f32 %v1262_v62  ;;  %v1263_v7 = vadd.f32 1.0, %v2237_v1 }
 0x180   : > { %v2241_v5 = vpop.eup %2240  ;;  %v1348_v8 = vpack.c.bf16 %v1318_v45, %v1316_v43  ;;  %v1304_v14 = vmul.f32 %v2239_v4, %v2698_v51  ;;  %v1196_v36 = vpop.f32.mrf.mxu1  ;;  %v1331_v43 = vld [vmem:[#allocation2 + $0x30] sm:$0xff]  ;;  %v1332_v45 = vld [vmem:[#allocation2] sm:$0xff]  ;;  %v1333_v4 = vld [vmem:[#allocation2 + $0x58] sm:$0xff] }
 0x181   : > { %v2243_v47 = vpop.eup %2242  ;;  %v1264_v10 = vadd.f32 1.0, %v2241_v5  ;;  %v1334_v5 = vld [vmem:[#allocation2 + $0x18] sm:$0xff] }
 0x182   : > { %v2245_v13 = vpop.eup %2244  ;;  %v1305_v59 = vmul.f32 %v2243_v47, %v2703_v54  ;;  %1579 = vmatprep.mubr.bf16.mxu0 %v1348_v8  ;;  %v1320_v23 = vmul.f32 %v1304_v14, %v2732_v18  ;;  %v1319_v54 = vmul.f32 %v1303_v0, %v2724_v9  ;;  %v1335_v8 = vld [vmem:[#allocation2 + $0x50] sm:$0xff]  ;;  %v1338_v0 = vld [vmem:[#allocation2 + $0x48] sm:$0xff] }
 0x183   : > { %v2247_v16 = vpop.eup %2246  ;;  %2258 = vrcp.f32 %v1264_v10  ;;  %v1265_v17 = vadd.f32 1.0, %v2245_v13  ;;  %1580 = vmatmul.mubr.bf16.vlgmr.msra.gmra.mxu0 %v1347_v12  ;;  %v1336_v12 = vld [vmem:[#allocation2 + $0x68] sm:$0xff] }
 0x184   : > { %v2249_v53 = vpop.eup %2248  ;;  %v1306_v19 = vmul.f32 %v2247_v16, %v2708_v57  ;;  %2260 = vrcp.f32 %v1263_v7  ;;  %v1321_v22 = vmul.f32 %v1305_v59, %v1178_v27  ;;  %v1337_v59 = vld [vmem:[#allocation2 + $0x8] sm:$0xff] }
 0x185   : > { %2262 = vrcp.f32 %v1265_v17  ;;  %v1266_v21 = vadd.f32 1.0, %v2249_v53 }
 0x186   : > { %v1322_v51 = vmul.f32 %v1306_v19, %v1180_v34  ;;  %v1349_v30 = vpack.c.bf16 %v1321_v22, %v1319_v54  ;;  %v1341_v54 = vld [vmem:[#allocation2 + $0x10] sm:$0xff] }
 0x187   : > { %2264 = vrcp.f32 %v1266_v21  ;;  %v1339_v21 = vld [vmem:[#allocation2 + $0x40] sm:$0xff] }
 0x188   : > { %v2251_v26 = vpop.eup %2250  ;;  %v1350_v28 = vpack.c.bf16 %v1322_v51, %v1320_v23  ;;  %v1340_v23 = vld [vmem:[#allocation2 + $0x20] sm:$0xff] }
 0x189   : > { %v2253_v49 = vpop.eup %2252  ;;  %v1308_v57 = vmul.f32 %v2251_v26, %v2718_v2  ;;  %v1198_v2 = vpop.f32.mrf.mxu1 }
 0x18a   : > { %v2255_v31 = vpop.eup %2254  ;;  %1589 = vmatprep.mubr.bf16.mxu0 %v1350_v28  ;;  %v1307_v18 = vmul.f32 %v2253_v49, %v2713_v61  ;;  %v1342_v49 = vld [vmem:[#allocation2 + $0x38] sm:$0xff] }
 0x18b   : > { %v1309_v33 = vmul.f32 %v2255_v31, %v2721_v6  ;;  %1590 = vmatmul.mubr.bf16.gmra.mxu0 %v1349_v30  ;;  %v1324_v9 = vmul.f32 %v1308_v57, %v1186_v3  ;;  %v1200_v58 = vpop.f32.mrf.mxu1 }
 0x18c   : > { %v2257_v27 = vpop.eup %2256  ;;  %v1323_v39 = vmul.f32 %v1307_v18, %v2745_v46 }
 0x18d   : > { %v1310_v34 = vmul.f32 %v2257_v27, %v2726_v11  ;;  %v1325_v35 = vmul.f32 %v1309_v33, %v1188_v56  ;;  %v1344_v27 = vld [vmem:[#allocation2 + $0x70] sm:$0xff] }
 0x18f   : > { %v1326_v37 = vmul.f32 %v1310_v34, %v1190_v25  ;;  %v1351_v48 = vpack.c.bf16 %v1325_v35, %v1323_v39  ;;  %v1345_v35 = vld [vmem:[#allocation2 + $0x78] sm:$0xff] }
 0x190   : > { %v2259_v38 = vpop.eup %2258 }
 0x191   : > { %v2261_v40 = vpop.eup %2260  ;;  %v1352_v42 = vpack.c.bf16 %v1326_v37, %v1324_v9  ;;  %v1312_v6 = vmul.f32 %v2259_v38, %v2734_v20  ;;  %v1346_v37 = vld [vmem:[#allocation2 + $0x28] sm:$0xff] }
 0x192   : > { %v2263_v44 = vpop.eup %2262  ;;  %v1311_v11 = vmul.f32 %v2261_v40, %v2729_v15 }
 0x193   : > { %v1313_v50 = vmul.f32 %v2263_v44, %v2737_v24  ;;  %1599 = vmatprep.mubr.bf16.mxu1 %v1352_v42  ;;  %v1328_v60 = vmul.f32 %v1312_v6, %v1196_v36 }
 0x194   : > { %v2265_v61 = vpop.eup %2264  ;;  %1600 = vmatmul.mubr.bf16.vlgmr.msra.gmra.mxu1 %v1351_v48  ;;  %v1327_v62 = vmul.f32 %v1311_v11, %v1194_v32  ;;  %v1343_v32 = vld [vmem:[#allocation2 + $0x60] sm:$0xff] }
 0x195   : > { %v1314_v52 = vmul.f32 %v2265_v61, %v2740_v29  ;;  %v1329_v55 = vmul.f32 %v1313_v50, %v1198_v2 }
 0x197   : > { %v1330_v46 = vmul.f32 %v1314_v52, %v1200_v58  ;;  %v1353_v1 = vpack.c.bf16 %v1329_v55, %v1327_v62 }
 0x199   : > { %v1354_v63 = vpack.c.bf16 %v1330_v46, %v1328_v60 }
 0x19b   : > { %1609 = vmatprep.mubr.bf16.mxu1 %v1354_v63 }
 0x19c   : > { %1610 = vmatmul.mubr.bf16.gmra.mxu1 %v1353_v1 }
 0x243   : > { %v1581_v20 = vpop.f32.mrf.mxu0 }
 0x244   : > { %v1620_v24 = vadd.f32 %v1581_v20, %v1331_v43 }
 0x245   : > { %v1583_v3 = vpop.f32.mrf.mxu0 }
 0x246   : > { %1636 = vst [vmem:[#allocation2 + $0x30] sm:$0xff] %v1620_v24  ;;  %v1621_v15 = vadd.f32 %v1583_v3, %v1332_v45 }
 0x247   : > { %v1585_v41 = vpop.f32.mrf.mxu0 }
 0x248   : > { %1637 = vst [vmem:[#allocation2] sm:$0xff] %v1621_v15  ;;  %v1622_v29 = vadd.f32 %v1585_v41, %v1333_v4 }
 0x249   : > { %v1587_v7 = vpop.f32.mrf.mxu0 }
 0x24a   : > { %1638 = vst [vmem:[#allocation2 + $0x58] sm:$0xff] %v1622_v29  ;;  %v1623_v47 = vadd.f32 %v1587_v7, %v1334_v5 }
 0x24b   : > { %v1591_v10 = vpop.f32.mrf.mxu0 }
 0x24c   : > { %1639 = vst [vmem:[#allocation2 + $0x18] sm:$0xff] %v1623_v47  ;;  %v1624_v13 = vadd.f32 %v1591_v10, %v1335_v8 }
 0x24d   : > { %v1593_v14 = vpop.f32.mrf.mxu0 }
 0x24e   : > { %1640 = vst [vmem:[#allocation2 + $0x50] sm:$0xff] %v1624_v13  ;;  %v1625_v56 = vadd.f32 %v1593_v14, %v1336_v12 }
 0x24f   : > { %v1595_v16 = vpop.f32.mrf.mxu0 }
 0x250   : > { %1641 = vst [vmem:[#allocation2 + $0x68] sm:$0xff] %v1625_v56  ;;  %v1626_v17 = vadd.f32 %v1595_v16, %v1337_v59 }
 0x251   : > { %v1597_v53 = vpop.f32.mrf.mxu0 }
 0x252   : > { %1642 = vst [vmem:[#allocation2 + $0x8] sm:$0xff] %v1626_v17  ;;  %v1627_v19 = vadd.f32 %v1597_v53, %v1338_v0 }
 0x254   : > { %1643 = vst [vmem:[#allocation2 + $0x48] sm:$0xff] %v1627_v19  ;;  %v1601_v22 = vpop.f32.mrf.mxu1 }
 0x255   : > { %v1628_v51 = vadd.f32 %v1601_v22, %v1339_v21 }
 0x256   : > { %v1603_v25 = vpop.f32.mrf.mxu1 }
 0x257   : > { %1644 = vst [vmem:[#allocation2 + $0x40] sm:$0xff] %v1628_v51  ;;  %v1629_v26 = vadd.f32 %v1603_v25, %v1340_v23 }
 0x258   : > { %v1605_v28 = vpop.f32.mrf.mxu1 }
 0x259   : > { %1645 = vst [vmem:[#allocation2 + $0x20] sm:$0xff] %v1629_v26  ;;  %v1630_v30 = vadd.f32 %v1605_v28, %v1341_v54 }
 0x25a   : > { %v1607_v31 = vpop.f32.mrf.mxu1 }
 0x25b   : > { %1646 = vst [vmem:[#allocation2 + $0x10] sm:$0xff] %v1630_v30  ;;  %v1631_v57 = vadd.f32 %v1607_v31, %v1342_v49 }
 0x25c   : > { %v1611_v33 = vpop.f32.mrf.mxu1 }
 0x25d   : > { %1647 = vst [vmem:[#allocation2 + $0x38] sm:$0xff] %v1631_v57  ;;  %v1632_v18 = vadd.f32 %v1611_v33, %v1343_v32 }
 0x25e   : > { %v1613_v34 = vpop.f32.mrf.mxu1 }
 0x25f   : > { %1648 = vst [vmem:[#allocation2 + $0x60] sm:$0xff] %v1632_v18  ;;  %v1633_v36 = vadd.f32 %v1613_v34, %v1344_v27 }
 0x260   : > { %v1615_v9 = vpop.f32.mrf.mxu1 }
 0x261   : > { %1649 = vst [vmem:[#allocation2 + $0x70] sm:$0xff] %v1633_v36  ;;  %v1634_v38 = vadd.f32 %v1615_v9, %v1345_v35  ;;  %1655 = sbr.rel (%p1949_p13) target bundleno = 623 (0x26f), region = 120 }
 0x262   : > { %v1617_v39 = vpop.f32.mrf.mxu1 }
 0x263   : > { %1650 = vst [vmem:[#allocation2 + $0x78] sm:$0xff] %v1634_v38  ;;  %v1635_v40 = vadd.f32 %v1617_v39, %v1346_v37 }
 0x265   : > { %1651 = vst [vmem:[#allocation2 + $0x28] sm:$0xff] %v1635_v40 }
 0x266   : > { %v1656_v42 = vld [vmem:[#allocation2 + $0x30] sm:$0xff]  ;;  %v1657_v44 = vld [vmem:[#allocation2] sm:$0xff]  ;;  %v1658_v48 = vld [vmem:[#allocation2 + $0x58] sm:$0xff] }
 0x267   : > { %1672 = vst [vmem:[%s2567_s11] sm:$0xff] %v1656_v42  ;;  %1673 = vst [vmem:[%s2567_s11 + $0x8] sm:$0xff] %v1657_v44  ;;  %v1659_v2 = vld [vmem:[#allocation2 + $0x18] sm:$0xff]  ;;  %v1660_v6 = vld [vmem:[#allocation2 + $0x50] sm:$0xff] }
 0x268   : > { %1674 = vst [vmem:[%s2567_s11 + $0x10] sm:$0xff] %v1658_v48  ;;  %v1661_v50 = vld [vmem:[#allocation2 + $0x68] sm:$0xff]  ;;  %1675 = vst [vmem:[%s2567_s11 + $0x18] sm:$0xff] %v1659_v2  ;;  %v1664_v52 = vld [vmem:[#allocation2 + $0x40] sm:$0xff] }
 0x269   : > { %1676 = vst [vmem:[%s2567_s11 + $0x20] sm:$0xff] %v1660_v6  ;;  %1677 = vst [vmem:[%s2567_s11 + $0x28] sm:$0xff] %v1661_v50  ;;  %v1662_v61 = vld [vmem:[#allocation2 + $0x8] sm:$0xff]  ;;  %v1665_v55 = vld [vmem:[#allocation2 + $0x20] sm:$0xff] }
 0x26a   : > { %v1663_v11 = vld [vmem:[#allocation2 + $0x48] sm:$0xff]  ;;  %1678 = vst [vmem:[%s2567_s11 + $0x30] sm:$0xff] %v1662_v61  ;;  %1680 = vst [vmem:[%s2567_s11 + $0x40] sm:$0xff] %v1664_v52  ;;  %v1666_v58 = vld [vmem:[#allocation2 + $0x10] sm:$0xff] }
 0x26b   : > { %1679 = vst [vmem:[%s2567_s11 + $0x38] sm:$0xff] %v1663_v11  ;;  %v1667_v60 = vld [vmem:[#allocation2 + $0x38] sm:$0xff]  ;;  %1681 = vst [vmem:[%s2567_s11 + $0x48] sm:$0xff] %v1665_v55  ;;  %v1668_v46 = vld [vmem:[#allocation2 + $0x60] sm:$0xff] }
 0x26c   : > { %1682 = vst [vmem:[%s2567_s11 + $0x50] sm:$0xff] %v1666_v58  ;;  %1683 = vst [vmem:[%s2567_s11 + $0x58] sm:$0xff] %v1667_v60  ;;  %v1669_v62 = vld [vmem:[#allocation2 + $0x70] sm:$0xff]  ;;  %v1670_v63 = vld [vmem:[#allocation2 + $0x78] sm:$0xff] }
 0x26d   : > { %1684 = vst [vmem:[%s2567_s11 + $0x60] sm:$0xff] %v1668_v46  ;;  %1685 = vst [vmem:[%s2567_s11 + $0x68] sm:$0xff] %v1669_v62  ;;  %v1671_v1 = vld [vmem:[#allocation2 + $0x28] sm:$0xff] }
 0x26e   : > { %1686 = vst [vmem:[%s2567_s11 + $0x70] sm:$0xff] %v1670_v63  ;;  %1687 = vst [vmem:[%s2567_s11 + $0x78] sm:$0xff] %v1671_v1 }
 0x26f PF: > { %s14_s21 = sadd.s32 1, %s2320_s21   ;;  %s2812_s15 = smov %s2300_s16 }
 0x270   : > { %p11_p0 = scmp.ge.s32.totalorder %s14_s21, 6   ;;  %s2813_s16 = smov %s2401_s27 }
 0x271   : > { %s2814_s17 = smov %s2312_s19  ;;  %s2815_s18 = smov %s2316_s20 }
 0x272   : > { %s2816_s19 = smov %s2819_s22  ;;  %s2817_s20 = smov %s2823_s23 }
 0x273   :  { %13 = sbr.rel (!%p11_p0) target bundleno = 4 (0x4), region = 169 }

</bundles_post_ra>
